<compile_context>
chip_gen: v6e
topology: v6e:2x2x1
jax: 0.10.0
libtpu: 0.0.40
codegen_flags: <defaults>
</compile_context>

<pallas_src>
import functools

import jax
import jax.numpy as jnp
from jax.experimental import pallas as pl
from jax.experimental.pallas import tpu as pltpu


# ---------------------------------------------------------------------------
# Kernel A (fast path, no reduction axis):
#   out_row_block = maybe_relu( (S_row_block @ X_resident) @ Wt + b )
# ---------------------------------------------------------------------------
def _gcn_layer_kernel_nored(s_ref, x_ref, wt_ref, b_ref, o_ref, *, apply_relu):
    # Aggregation: bf16 operands, f32 accumulation on the MXU.
    agg = jnp.dot(s_ref[...], x_ref[...], preferred_element_type=jnp.float32)
    # Feature transform: bf16 operands (single-pass MXU), f32 accumulation.
    out = jnp.dot(agg.astype(jnp.bfloat16), wt_ref[...],
                  preferred_element_type=jnp.float32) + b_ref[...]
    if apply_relu:
        out = jnp.maximum(out, 0.0)
    o_ref[...] = out.astype(o_ref.dtype)


# ---------------------------------------------------------------------------
# Kernel B (large-N path, k-reduction over S columns):
#   acc += S_tile @ X_tile ; epilogue on last k step.
# ---------------------------------------------------------------------------
def _gcn_layer_kernel_red(s_ref, x_ref, wt_ref, b_ref, o_ref, acc_ref, *, apply_relu):
    k = pl.program_id(1)
    part = jnp.dot(s_ref[...], x_ref[...], preferred_element_type=jnp.float32)

    # Assign on k==0, accumulate otherwise (saves a full-accumulator zero store).
    @pl.when(k == 0)
    def _():
        acc_ref[...] = part

    @pl.when(k > 0)
    def _():
        acc_ref[...] += part

    @pl.when(k == pl.num_programs(1) - 1)
    def _():
        out = jnp.dot(acc_ref[...].astype(jnp.bfloat16), wt_ref[...],
                      preferred_element_type=jnp.float32) + b_ref[...]
        if apply_relu:
            out = jnp.maximum(out, 0.0)
        o_ref[...] = out.astype(o_ref.dtype)


# ---------------------------------------------------------------------------
# Helpers
# ---------------------------------------------------------------------------
def _round_up(v, m):
    return (v + m - 1) // m * m


def _pad2d(a, rows, cols):
    return jnp.pad(a, ((0, rows - a.shape[0]), (0, cols - a.shape[1])))


_MIB = 1024 * 1024


def gcn_layer_pallas(s_bf16, x_bf16, wt_bf16, b_f32, *, apply_relu, out_dtype,
                     tm, tk=None, force_reduction=False):
    """One GCN layer: out = maybe_relu((S @ X) @ Wt + b).

    s: (Np, Np) bf16, x: (Np, Fin_pad) bf16, wt: (Fin_pad, Fout_pad) bf16,
    b: (1, Fout_pad) f32.  All dims (8,128)-aligned; Np divisible by tm.
    """
    n_pad = s_bf16.shape[0]
    fin_pad = x_bf16.shape[1]
    fout_pad = wt_bf16.shape[1]
    out_isize = jnp.dtype(out_dtype).itemsize

    flops = 2 * n_pad * n_pad * fin_pad + 2 * n_pad * fin_pad * fout_pad

    # --- fast path: resident X, no reduction axis --------------------------
    # Conservative footprint (count every input as double-buffered).
    nored_vmem = (2 * tm * n_pad * 2            # S row blocks (bf16)
                  + 2 * n_pad * fin_pad * 2     # resident X (bf16)
                  + 2 * fin_pad * fout_pad * 2  # Wt (bf16)
                  + 2 * tm * fout_pad * out_isize
                  + tm * fin_pad * 4)           # agg intermediate headroom
    use_nored = (not force_reduction) and nored_vmem <= 32 * _MIB

    if use_nored:
        grid = (n_pad // tm,)
        vmem_limit = int(max(32 * _MIB, min(48 * _MIB, nored_vmem * 1.3)))
        bytes_accessed = int(s_bf16.size * 2 + x_bf16.size * 2 + wt_bf16.size * 2
                             + b_f32.size * 4 + n_pad * fout_pad * out_isize)
        return pl.pallas_call(
            functools.partial(_gcn_layer_kernel_nored, apply_relu=apply_relu),
            out_shape=jax.ShapeDtypeStruct((n_pad, fout_pad), out_dtype),
            grid_spec=pltpu.PrefetchScalarGridSpec(
                num_scalar_prefetch=0,
                grid=grid,
                in_specs=[
                    pl.BlockSpec((tm, n_pad), lambda i: (i, 0)),        # S row block
                    pl.BlockSpec((n_pad, fin_pad), lambda i: (0, 0)),   # X resident
                    pl.BlockSpec((fin_pad, fout_pad), lambda i: (0, 0)),  # Wt resident
                    pl.BlockSpec((1, fout_pad), lambda i: (0, 0)),      # bias resident
                ],
                out_specs=pl.BlockSpec((tm, fout_pad), lambda i: (i, 0)),
            ),
            compiler_params=pltpu.CompilerParams(
                dimension_semantics=("parallel",),
                vmem_limit_bytes=vmem_limit,
            ),
            cost_estimate=pl.CostEstimate(
                flops=int(flops), transcendentals=0, bytes_accessed=bytes_accessed),
        )(s_bf16, x_bf16, wt_bf16, b_f32)

    # --- large-N path: tiled k-reduction ------------------------------------
    if tk is None:
        tk = max(t for t in (128, 256, 512) if t <= n_pad and n_pad % t == 0)
    grid = (n_pad // tm, n_pad // tk)

    red_vmem = (2 * tm * tk * 2               # S tiles
                + 2 * tk * fin_pad * 2        # X node-blocks
                + tm * fin_pad * 4            # acc scratch
                + 2 * fin_pad * fout_pad * 2  # Wt
                + 2 * tm * fout_pad * out_isize)
    vmem_limit = int(max(32 * _MIB, min(48 * _MIB, red_vmem * 1.5)))
    bytes_accessed = int(s_bf16.size * 2
                         + (n_pad // tm) * x_bf16.size * 2   # X re-read per row tile
                         + wt_bf16.size * 2 + b_f32.size * 4
                         + n_pad * fout_pad * out_isize)
    return pl.pallas_call(
        functools.partial(_gcn_layer_kernel_red, apply_relu=apply_relu),
        out_shape=jax.ShapeDtypeStruct((n_pad, fout_pad), out_dtype),
        grid_spec=pltpu.PrefetchScalarGridSpec(
            num_scalar_prefetch=0,
            grid=grid,
            in_specs=[
                pl.BlockSpec((tm, tk), lambda i, k: (i, k)),            # S tile
                pl.BlockSpec((tk, fin_pad), lambda i, k: (k, 0)),       # X node-block
                pl.BlockSpec((fin_pad, fout_pad), lambda i, k: (0, 0)),  # Wt resident
                pl.BlockSpec((1, fout_pad), lambda i, k: (0, 0)),       # bias resident
            ],
            out_specs=pl.BlockSpec((tm, fout_pad), lambda i, k: (i, 0)),
            scratch_shapes=[pltpu.VMEM((tm, fin_pad), jnp.float32)],
        ),
        compiler_params=pltpu.CompilerParams(
            dimension_semantics=("parallel", "arbitrary"),
            vmem_limit_bytes=vmem_limit,
        ),
        cost_estimate=pl.CostEstimate(
            flops=int(flops), transcendentals=0, bytes_accessed=bytes_accessed),
    )(s_bf16, x_bf16, wt_bf16, b_f32)


# ---------------------------------------------------------------------------
# Full forward: two GCN layers (ReLU after the first).
# ---------------------------------------------------------------------------
def gcn_forward_pallas(s, x, w1, b1, w2, b2, *, force_reduction=False, tk=None):
    """s: (N,N) normalized adjacency; x: (N,Cin); w1: (H,Cin); b1: (H,);
    w2: (C,H); b2: (C,)."""
    n = x.shape[0]
    num_classes = w2.shape[0]

    # Row tile: keep >= 2 row blocks (v7x megacore) while growing toward 512 at large N.
    if n <= 256:
        tm = 128
    elif n <= 1024:
        tm = 256
    else:
        tm = 512
    n_pad = _round_up(n, tm)
    cin_pad = _round_up(x.shape[1], 128)
    h_pad = _round_up(w1.shape[0], 128)
    c_pad = _round_up(num_classes, 128)

    # Cast to bf16 BEFORE padding (no padded f32 N^2 copy); weights padded as bf16.
    s_p = _pad2d(s.astype(jnp.bfloat16), n_pad, n_pad)
    x_p = _pad2d(x.astype(jnp.bfloat16), n_pad, cin_pad)
    w1t_p = _pad2d(w1.T.astype(jnp.bfloat16), cin_pad, h_pad)
    b1_p = _pad2d(b1.reshape(1, -1).astype(jnp.float32), 1, h_pad)
    w2t_p = _pad2d(w2.T.astype(jnp.bfloat16), h_pad, c_pad)
    b2_p = _pad2d(b2.reshape(1, -1).astype(jnp.float32), 1, c_pad)

    # Layer 1 (+ ReLU). Intermediate h kept bf16 (tiny HBM round-trip at small N).
    # Note: padded rows of h equal relu(b1), which is harmless because the matching
    # columns of S are zero and padded output rows are sliced away below.
    h = gcn_layer_pallas(s_p, x_p, w1t_p, b1_p, apply_relu=True,
                         out_dtype=jnp.bfloat16, tm=tm, tk=tk,
                         force_reduction=force_reduction)
    # TODO(synk): F.dropout(p=0.5) is only active in training; eval-mode forward => identity.
    # Layer 2 (logits, f32 out).
    out = gcn_layer_pallas(s_p, h, w2t_p, b2_p, apply_relu=False,
                           out_dtype=jnp.float32, tm=tm, tk=tk,
                           force_reduction=force_reduction)
    return out[:n, :num_classes]


# ---------------------------------------------------------------------------
# Plain-JAX glue: dense normalized adjacency and an f32 reference.
# ---------------------------------------------------------------------------
def build_normalized_adjacency(edge_index, num_nodes):
    """Dense S = D^{-1/2} (A + I) D^{-1/2} from a (2, E) edge_index (GCNConv default).

    Scatter-ADD so duplicate edges sum, matching torch_geometric's per-edge messages.
    """
    src, dst = edge_index[0], edge_index[1]
    a = jnp.zeros((num_nodes, num_nodes), jnp.float32).at[src, dst].add(1.0)
    a_hat = a + jnp.eye(num_nodes, dtype=jnp.float32)
    deg = a_hat.sum(axis=1)
    dinv_sqrt = jnp.where(deg > 0, 1.0 / jnp.sqrt(deg), 0.0)
    return dinv_sqrt[:, None] * a_hat * dinv_sqrt[None, :]


def reference_forward(s, x, w1, b1, w2, b2):
    h = jnp.maximum(s @ (x @ w1.T) + b1, 0.0)
    return s @ (h @ w2.T) + b2


if __name__ == "__main__":
    # Small, module-consistent shapes (enough nodes for a multi-block row grid).
    N = 256
    IN_CHANNELS = 16
    HIDDEN_CHANNELS = 32
    NUM_CLASSES = 2

    key = jax.random.PRNGKey(0)
    k_x, k_w1, k_b1, k_w2, k_b2, k_e = jax.random.split(key, 6)

    # Node features.
    x = jax.random.normal(k_x, (N, IN_CHANNELS), dtype=jnp.float32)

    # Deterministic graph: undirected ring plus a few random chords.
    ring_src = jnp.arange(N)
    ring_dst = (ring_src + 1) % N
    extra_src = jax.random.randint(k_e, (64,), 0, N)
    extra_dst = (extra_src + 7) % N
    src = jnp.concatenate([ring_src, ring_dst, extra_src, extra_dst])
    dst = jnp.concatenate([ring_dst, ring_src, extra_dst, extra_src])
    edge_index = jnp.stack([src, dst])            # (2, 640)

    s = build_normalized_adjacency(edge_index, N)

    # Deterministic parameter init (GCNConv: linear weight (out, in) + bias (out,)).
    w1 = 0.1 * jax.random.normal(k_w1, (HIDDEN_CHANNELS, IN_CHANNELS), dtype=jnp.float32)
    b1 = 0.1 * jax.random.normal(k_b1, (HIDDEN_CHANNELS,), dtype=jnp.float32)
    w2 = 0.1 * jax.random.normal(k_w2, (NUM_CLASSES, HIDDEN_CHANNELS), dtype=jnp.float32)
    b2 = 0.1 * jax.random.normal(k_b2, (NUM_CLASSES,), dtype=jnp.float32)

    ref = reference_forward(s, x, w1, b1, w2, b2)

    # Fast path (resident X, no reduction axis) — the path hit at this N.
    out_fast = jax.block_until_ready(gcn_forward_pallas(s, x, w1, b1, w2, b2))
    assert out_fast.shape == (N, NUM_CLASSES)
    assert jnp.allclose(out_fast, ref, rtol=2e-2, atol=2e-2), \
        "Pallas fast-path mismatch vs reference"

    # Large-N tiled reduction path, forced here with tk=128 to exercise accumulation.
    out_red = jax.block_until_ready(
        gcn_forward_pallas(s, x, w1, b1, w2, b2, force_reduction=True, tk=128))
    assert out_red.shape == (N, NUM_CLASSES)
    assert jnp.allclose(out_red, ref, rtol=2e-2, atol=2e-2), \
        "Pallas reduction-path mismatch vs reference"

    print("KERNEL_OK")
</pallas_src>

<mosaic_0001>
module attributes {stable_mosaic.version = 11 : i64} {
  func.func @_gcn_layer_kernel_nored(%arg0: i32, %arg1: memref<128x256xbf16, #tpu.memory_space<vmem>>, %arg2: memref<256x128xbf16, #tpu.memory_space<vmem>>, %arg3: memref<128x128xbf16, #tpu.memory_space<vmem>>, %arg4: memref<1x128xf32, #tpu.memory_space<vmem>>, %arg5: memref<128x128xbf16, #tpu.memory_space<vmem>>) attributes {dimension_semantics = [#tpu.dimension_semantics<parallel>], iteration_bounds = array<i64: 2>, scalar_prefetch = 0 : i64, scratch_operands = 0 : i64, tpu.core_type = #tpu.core_type<tc>, window_params = [{transform_indices = @transform_0, window_bounds = array<i64: 128, 256>}, {pipeline_mode = #tpu.pipeline_mode<synchronous>, transform_indices = @transform_1, window_bounds = array<i64: 256, 128>}, {pipeline_mode = #tpu.pipeline_mode<synchronous>, transform_indices = @transform_2, window_bounds = array<i64: 128, 128>}, {pipeline_mode = #tpu.pipeline_mode<synchronous>, transform_indices = @transform_3, window_bounds = array<i64: 1, 128>}, {transform_indices = @transform_4, window_bounds = array<i64: 128, 128>}]} {
    %c0 = arith.constant 0 : index
    %c0_0 = arith.constant 0 : index
    %0 = vector.load %arg1[%c0, %c0_0] : memref<128x256xbf16, #tpu.memory_space<vmem>>, vector<128x256xbf16>
    %c0_1 = arith.constant 0 : index
    %c0_2 = arith.constant 0 : index
    %1 = vector.load %arg2[%c0_1, %c0_2] : memref<256x128xbf16, #tpu.memory_space<vmem>>, vector<256x128xbf16>
    %cst = arith.constant dense<0.000000e+00> : vector<128x128xf32>
    %2 = tpu.matmul %0, %1, %cst {dimension_numbers = #tpu.dot_dimension_numbers<[1], [0], [0], [1], [0, 0, 1, 1], [], []>} : vector<128x256xbf16>, vector<256x128xbf16>, vector<128x128xf32> -> vector<128x128xf32>
    %3 = arith.truncf %2 : vector<128x128xf32> to vector<128x128xbf16>
    %c0_3 = arith.constant 0 : index
    %c0_4 = arith.constant 0 : index
    %4 = vector.load %arg3[%c0_3, %c0_4] : memref<128x128xbf16, #tpu.memory_space<vmem>>, vector<128x128xbf16>
    %cst_5 = arith.constant dense<0.000000e+00> : vector<128x128xf32>
    %5 = tpu.matmul %3, %4, %cst_5 {dimension_numbers = #tpu.dot_dimension_numbers<[1], [0], [0], [1], [0, 0, 1, 1], [], []>} : vector<128x128xbf16>, vector<128x128xbf16>, vector<128x128xf32> -> vector<128x128xf32>
    %c0_6 = arith.constant 0 : index
    %c0_7 = arith.constant 0 : index
    %6 = vector.load %arg4[%c0_6, %c0_7] : memref<1x128xf32, #tpu.memory_space<vmem>>, vector<1x128xf32>
    %7 = vector.broadcast %6 : vector<1x128xf32> to vector<128x128xf32>
    %8 = arith.addf %5, %7 : vector<128x128xf32>
    %cst_8 = arith.constant 0.000000e+00 : f32
    %9 = vector.broadcast %cst_8 : f32 to vector<128x128xf32>
    %10 = arith.maximumf %8, %9 : vector<128x128xf32>
    %11 = arith.truncf %10 : vector<128x128xf32> to vector<128x128xbf16>
    %c0_9 = arith.constant 0 : index
    %c0_10 = arith.constant 0 : index
    %12 = vector.load %arg5[%c0_9, %c0_10] : memref<128x128xbf16, #tpu.memory_space<vmem>>, vector<128x128xbf16>
    tpu.vector_store %arg5[%c0_9, %c0_10], %11 {strides = array<i32>} : memref<128x128xbf16, #tpu.memory_space<vmem>>, vector<128x128xbf16>,
    return
  }
  func.func @transform_0(%arg0: i32) -> (i32, i32) {
    %c0_i32 = arith.constant 0 : i32
    %c0_i32_0 = arith.constant 0 : i32
    return %arg0, %c0_i32 : i32, i32
  }
  func.func @transform_1(%arg0: i32) -> (i32, i32) {
    %c0_i32 = arith.constant 0 : i32
    %c0_i32_0 = arith.constant 0 : i32
    %c0_i32_1 = arith.constant 0 : i32
    return %c0_i32, %c0_i32_0 : i32, i32
  }
  func.func @transform_2(%arg0: i32) -> (i32, i32) {
    %c0_i32 = arith.constant 0 : i32
    %c0_i32_0 = arith.constant 0 : i32
    %c0_i32_1 = arith.constant 0 : i32
    return %c0_i32, %c0_i32_0 : i32, i32
  }
  func.func @transform_3(%arg0: i32) -> (i32, i32) {
    %c0_i32 = arith.constant 0 : i32
    %c0_i32_0 = arith.constant 0 : i32
    %c0_i32_1 = arith.constant 0 : i32
    return %c0_i32, %c0_i32_0 : i32, i32
  }
  func.func @transform_4(%arg0: i32) -> (i32, i32) {
    %c0_i32 = arith.constant 0 : i32
    %c0_i32_0 = arith.constant 0 : i32
    return %arg0, %c0_i32 : i32, i32
  }
}

</mosaic_0001>

<bundles_post_ra>
// kernel: tpu_custom_call.1
= control target key start
LH: loop header
LB: loop body
LE: loop exit
PB: predicated region body
PF: predicated region fallthrough
CT: control target
= control target key end

     0   :  { %9 = vsyncpa [#allocation3], 0  ;;  %s1729_s0 = inlined_call_operand.hbm [shape: bf16[256,256], index: 0, kind: input, shape index: {}]   ;;  %s1730_s1 = inlined_call_operand.hbm [shape: bf16[256,128], index: 1, kind: input, shape index: {}]   ;;  %s1731_s2 = inlined_call_operand.hbm [shape: bf16[128,128], index: 2, kind: input, shape index: {}]   ;;  %s1732_s3 = inlined_call_operand.vmem [shape: f32[1,128], index: 3, kind: input, shape index: {}]   ;;  %s1733_s4 = inlined_call_operand.hbm [shape: bf16[256,128], index: 4, kind: output, shape index: {}]  }
   0x1   :  { %11 = vsyncpa [#allocation3 + $0x1], 0 }
   0x2   :  { %12 = vsyncpa [#allocation6], 0 }
   0x3   :  { %13 = vsyncpa [#allocation4], 0 }
   0x4   :  { %15 = vsyncpa [#allocation4 + $0x1], 0  ;;  %s1508_s15 = smov 0   ;;  %s1510_s16 = smov 0  }
   0x5   :  { %s1512_s17 = smov 0   ;;  %s1514_s18 = smov 0  }
   0x6 LB: > { %s1529_s19 = sadd.s32 4294967295, %s1471_s18   ;;  %s948_s20 = sadd.s32 4294967294, %s1471_s18   ;;  %s1471_s18 = sphi %s1514_s18, %s1755_s18   ;;  %s1467_s17 = sphi %s1512_s17, %s1754_s17   ;;  %s1463_s16 = sphi %s1510_s16, %s1753_s16   ;;  %s1459_s15 = sphi %s1508_s15, %s1752_s15  }
   0x7   : > { %p41_p0 = scmp.ne.s32.totalorder %s1463_s16, %s1459_s15  ;;  %p1734_p1 = scmp.eq.s32.totalorder %s1529_s19, 0 }
   0x8   : > { %p134_p3 = scmp.eq.s32.totalorder %s948_s20, 1  ;;  %p949_p5 = scmp.ge.s32.totalorder %s1471_s18, 1 }
   0x9   : > { %p1538_p4 = por %p1734_p1, %p41_p0  ;;  %p141_p7 = scmp.lt.s32.totalorder %s1471_s18, 3 }
   0xa   : > { %p1543_p6 = por %p134_p3, %p41_p0  ;;  %s1473_s24 = smov [#allocation5]  }
   0xb   : > { %s1738_s21 = scalar_select %p1538_p4, 1, 0 }
   0xc   : > { %s1739_s22 = scalar_select %p1543_p6, 1, 0 }
   0xd   : > { %p1548_p8 = pnand %p949_p5, %p141_p7  ;;  %s153_s25 = sshll.u32 %s1473_s24, 4  ;;  %s154_s25 = int_to_ptr.vmem [resolvable:$true] %s153_s25 }
   0xe   : > { %s1474_s27 = smov [#allocation7]   ;;  %s1334_s29 = scalar_lea.vmem %s154_s25, 2048 }
   0xf   : > { %s1740_s23 = scalar_select %p1548_p8, 1, 0 }
  0x10   : > { %p1214_p9 = pneg %p1548_p8  ;;  %s166_s28 = sshll.u32 %s1474_s27, 4  ;;  %s167_s28 = int_to_ptr.vmem [resolvable:$true] %s166_s28 }
  0x11   : > { %p1335_p13 = scmp.ne.s32.totalorder %s154_s25, %s1334_s29  ;;  %p1342_p5 = scmp.lt.s32.totalorder %s154_s25, %s154_s25 }
  0x12   : > { %p1557_p11 = pnand %p1214_p9, %p1734_p1  ;;  %p1343_p7 = scmp.lt.s32.totalorder %s1334_s29, %s1334_s29 }
  0x14   : > { %p1325_p12 = pneg %p1557_p11  ;;  %p1344_p10 = por %p1343_p7, %p1342_p5 }
  0x16   : > { %p1337_p0 = pnand %p1335_p13, %p1325_p12 }
  0x18   : > { %p1338_p3 = pneg %p1337_p0 }
  0x1a   : > { %p1345_p9 = pnand %p1344_p10, %p1338_p3 }
  0x1c   : > { %1348 = shalt.err (!%p1345_p9)
}
  0x1d   : > { %s1475_s30 = smov 64   ;;  %s1476_s5 = smov 4  }
  0x1e   : > { %1217 = dma.hbm_to_vmem [thread:$0]  (!%p1557_p11), %s1730_s1, 2048, %s154_s25, [#allocation6], %s1475_s30, %s1475_s30, %s1476_s5  }
  0x1f   : > { %s1360_s8 = scalar_lea.vmem %s167_s28, 1024  ;;  %p1368_p2 = scmp.lt.s32.totalorder %s167_s28, %s167_s28 }
  0x20   : > { %p1361_p1 = scmp.ne.s32.totalorder %s167_s28, %s1360_s8  ;;  %p1369_p6 = scmp.lt.s32.totalorder %s1360_s8, %s1360_s8 }
  0x22   : > { %p1363_p13 = pnand %p1361_p1, %p1325_p12  ;;  %p1370_p5 = por %p1369_p6, %p1368_p2 }
  0x24   : > { %p1364_p0 = pneg %p1363_p13 }
  0x26   : > { %p1371_p10 = pnand %p1370_p5, %p1364_p0 }
  0x28   : > { %1374 = shalt.err (!%p1371_p10)
}
  0x29   : > { %1220 = dma.hbm_to_vmem [thread:$0]  (!%p1557_p11), %s1731_s2, 1024, %s167_s28, [#allocation6], %s1475_s30, %s1475_s30, %s1476_s5  }
  0x2a   : > { %s1580_s11 = sadd.s32 1, %s1471_s18   ;;  %s28_s12 = sadd.s32 1, %s1467_s17 }
  0x2b   : > { %s25_s13 = ssub.s32 %s1471_s18, %s1580_s11  ;;  %p35_p1 = scmp.ne.s32.totalorder %s1467_s17, %s1463_s16 }
  0x2c   : > { %p26_p2 = scmp.eq.s32.totalorder %s25_s13, 0  ;;  %p36_p6 = scmp.eq.s32.totalorder %s1471_s18, 0 }
  0x2d   : > { %p1742_p12 = scmp.eq.s32.totalorder %s1529_s19, 1  ;;  %p1231_p7 = scmp.lt.s32.totalorder %s1471_s18, 2 }
  0x2e   : > { %s1596_s20 = scalar_select %p26_p2, %s1467_s17, %s28_s12  }
  0x2f   : > { %p1590_p3 = por %p1742_p12, %p35_p1  ;;  %p37_p9 = por %p36_p6, %p35_p1 }
  0x30   : > { %s183_s24 = sand.u32 1, %s1467_s17   ;;  %s1025_s26 = sshll.u32 %s1471_s18, 11 }
  0x31   : > { %s1743_s14 = scalar_select %p1590_p3, 1, 0 }
  0x32   : > { %s953_s25 = sshll.u32 %s183_s24, 7  ;;  %s1603_s29 = scalar_lea.hbm %s1729_s0, %s1025_s26 }
  0x33   : > { %s187_s30 = scalar_lea.vmem [#allocation2], %s953_s25  ;;  %p1607_p11 = pnand %p1231_p7, %p37_p9 }
  0x34   : > { %s195_s5 = sshll.u32 %s187_s30, 4  ;;  %s1611_s7 = scalar_lea.sflag [#allocation3], %s183_s24  ;;  %s1605_s5 = int_to_ptr.vmem [resolvable:$true] %s195_s5 }
  0x35   : > { %s1375_s8 = scalar_lea.hbm %s1603_s29, 2048  ;;  %p1377_p0 = pneg %p1607_p11 }
  0x36   : > { %p1376_p13 = scmp.ne.s32.totalorder %s1603_s29, %s1375_s8  ;;  %s1380_s12 = scalar_lea.hbm %s1729_s0, 4096 }
  0x37   : > { %p1381_p1 = scmp.lt.s32.totalorder %s1603_s29, %s1729_s0  ;;  %p1382_p2 = scmp.lt.s32.totalorder %s1380_s12, %s1375_s8 }
  0x38   : > { %p1378_p5 = pnand %p1377_p0, %p1376_p13 }
  0x39   : > { %p1383_p6 = por %p1382_p2, %p1381_p1 }
  0x3a   : > { %p1379_p10 = pneg %p1378_p5 }
  0x3c   : > { %p1384_p12 = pnand %p1383_p6, %p1379_p10 }
  0x3e   : > { %1387 = shalt.err (!%p1384_p12)
}
  0x3f   : > { %s1388_s24 = scalar_lea.vmem %s1605_s5, 2048  ;;  %s1477_s26 = smov [#allocation2]  }
  0x40   : > { %p1389_p7 = scmp.ne.s32.totalorder %s1605_s5, %s1388_s24  ;;  %s1393_s27 = sshll.u32 %s1477_s26, 4  ;;  %s1394_s27 = int_to_ptr.vmem [resolvable:$false] %s1393_s27 }
  0x41   : > { %s1395_s28 = scalar_lea.vmem %s1394_s27, 4096  ;;  %p1396_p5 = scmp.lt.s32.totalorder %s1605_s5, %s1394_s27 }
  0x42   : > { %p1391_p9 = pnand %p1389_p7, %p1377_p0  ;;  %p1397_p3 = scmp.lt.s32.totalorder %s1395_s28, %s1388_s24 }
  0x44   : > { %p1392_p13 = pneg %p1391_p9  ;;  %p1398_p4 = por %p1397_p3, %p1396_p5 }
  0x46   : > { %p1399_p8 = pnand %p1398_p4, %p1392_p13 }
  0x48   : > { %1402 = shalt.err (!%p1399_p8)
}
  0x49   : > { %s1478_s30 = smov 128   ;;  %s1479_s8 = smov 8  }
  0x4a   : > { %1224 = dma.hbm_to_vmem [thread:$0]  (!%p1607_p11), %s1603_s29, 2048, %s1605_s5, %s1611_s7, %s1478_s30, %s1478_s30, %s1479_s8  }
  0x4b   : > { %p1745_p0 = scmp.ne.s32.totalorder %s1740_s23, 0 }
  0x4c   : > { %s1635_s9 = sand.u32 (!%p1745_p0), 1, %s1463_s16   ;;  %p1746_p4 = scmp.ne.s32.totalorder (!%p1745_p0), %s1738_s21, 0 }
  0x4d   : > { %207 = sbr.rel (%p1745_p0) target bundleno = 597 (0x255), region = 36  ;;  %s958_s10 = sshll.u32 (!%p1745_p0), %s1635_s9, 7 }
  0x4e   : > { %s210_s12 = scalar_lea.sflag (!%p1745_p0), [#allocation3], %s1635_s9  ;;  %s1639_s13 = scalar_lea.vmem (!%p1745_p0), [#allocation2], %s958_s10 }
  0x52   : > { %1446 = dma.done.wait (%p1746_p4), %s210_s12, 2048  }
  0x53   : > { %1448 = vsyncadd (%p1746_p4), %s210_s12, 4294965248  ;;  %p1747_p8 = scmp.eq.s32.totalorder %s1529_s19, 0 }
  0x55   : > { %1450 = dma.done.wait (%p1747_p8), [#allocation6], 3072   ;;  %p1748_p3 = pmov %p1747_p8 }
  0x56   : > { %v1275_v0 = vld [vmem:[#allocation5 + $0x78] sm:$0xff]   ;;  %v1277_v2 = vld [vmem:[#allocation5 + $0x70] sm:$0xff]   ;;  %v1279_v4 = vld [vmem:[#allocation5 + $0x68] sm:$0xff]   ;;  %s961_s29 = sshll.u32 %s1635_s9, 6  ;;  %s1042_s7 = sshll.u32 %s1529_s19, 10 }
  0x57   : > { %1452 = vsyncadd (%p1748_p3), [#allocation6], 4294964224  ;;  %v1276_v1 = vld [vmem:[#allocation5 + $0x38] sm:$0xff]   ;;  %1090 = vmatprep.subr.bf16.mxu0 %v1275_v0  ;;  %v1278_v3 = vld [vmem:[#allocation5 + $0x30] sm:$0xff]   ;;  %s1669_s5 = scalar_lea.vmem [#allocation8], %s961_s29  ;;  %s1684_s26 = scalar_lea.hbm %s1733_s4, %s1042_s7 }
  0x58   : > { %1091 = vmatpush3.bf16.msra.mxu0 %v1276_v1  ;;  %v1280_v5 = vld [vmem:[#allocation5 + $0x28] sm:$0xff]   ;;  %v1281_v6 = vld [vmem:[#allocation5 + $0x60] sm:$0xff]   ;;  %v1283_v8 = vld [vmem:[#allocation5 + $0x58] sm:$0xff]   ;;  %s856_s6 = sshll.u32 %s1669_s5, 4  ;;  %s843_s27 = scalar_lea.sflag [#allocation4], %s1635_s9  ;;  %s1679_s6 = int_to_ptr.vmem [resolvable:$true] %s856_s6 }
  0x59   : > { %1092 = vmatprep.subr.bf16.mxu0 %v1277_v2  ;;  %v1282_v7 = vld [vmem:[#allocation5 + $0x20] sm:$0xff]   ;;  %v1284_v9 = vld [vmem:[#allocation5 + $0x18] sm:$0xff]   ;;  %v1285_v10 = vld [vmem:[#allocation5 + $0x50] sm:$0xff]   ;;  %s1403_s28 = scalar_lea.vmem %s1679_s6, 1024  ;;  %p1749_p10 = scmp.ne.s32.totalorder %s1743_s14, 0 }
  0x5a   : > { %v1293_v11 = vld [vmem:[%s1639_s13 + $0x4] ss:$8 sps:$4 sm:$0xff]   ;;  %v1286_v12 = vld [vmem:[#allocation5 + $0x10] sm:$0xff]   ;;  %v1315_v17 = vld [vmem:[#allocation7 + $0x38] sm:$0xff]   ;;  %p1404_p11 = scmp.ne.s32.totalorder %s1679_s6, %s1403_s28  ;;  %s1480_s19 = smov [#allocation8]  }
  0x5b   : > { %505 = vmatprep.mubr.bf16.mxu0 %v1293_v11  ;;  %v1287_v13 = vld [vmem:[#allocation5 + $0x48] sm:$0xff]   ;;  %v1289_v15 = vld [vmem:[#allocation5 + $0x40] sm:$0xff]   ;;  %v1316_v19 = vld [vmem:[#allocation7 + $0x30] sm:$0xff]   ;;  %1170 = vmatprep.subr.bf16.mxu1 %v1315_v17  ;;  %s1407_s30 = sshll.u32 %s1480_s19, 4  ;;  %s1408_s30 = int_to_ptr.vmem [resolvable:$false] %s1407_s30 }
  0x5c   : > { %1093 = vmatpush3.bf16.msra.mxu0 %v1278_v3  ;;  %v1288_v14 = vld [vmem:[#allocation5 + $0x8] sm:$0xff]   ;;  %v1290_v16 = vld [vmem:[#allocation5] sm:$0xff]   ;;  %v1294_v20 = vld [vmem:[%s1639_s13 + $0x14] ss:$8 sps:$4 sm:$0xff]   ;;  %1171 = vmatpush3.bf16.msra.mxu1 %v1315_v17  ;;  %p1405_p1 = pnand %p1404_p11, %p1749_p10  ;;  %s1409_s8 = scalar_lea.vmem %s1408_s30, 2048 }
  0x5d   : > { %1094 = vmatprep.subr.bf16.mxu0 %v1279_v4  ;;  %v1291_v18 = vld [vmem:[%s1639_s13] ss:$8 sps:$4 sm:$0xff]   ;;  %1172 = vmatprep.subr.bf16.mxu1 %v1316_v19  ;;  %v1296_v23 = vld [vmem:[%s1639_s13 + $0x10] ss:$8 sps:$4 sm:$0xff]   ;;  %v1297_v24 = vld [vmem:[%s1639_s13 + $0x24] ss:$8 sps:$4 sm:$0xff]   ;;  %p1410_p6 = scmp.lt.s32.totalorder %s1679_s6, %s1408_s30  ;;  %p1411_p12 = scmp.lt.s32.totalorder %s1409_s8, %s1403_s28 }
  0x5e   : > { %v1317_v21 = vld [vmem:[#allocation7 + $0x28] sm:$0xff]   ;;  %v1318_v22 = vld [vmem:[#allocation7 + $0x20] sm:$0xff]   ;;  %v1300_v26 = vld [vmem:[%s1639_s13 + $0x34] ss:$8 sps:$4 sm:$0xff]   ;;  %p1406_p2 = pneg %p1405_p1 }
  0x5f   : > { %v1299_v25 = vld [vmem:[%s1639_s13 + $0x20] ss:$8 sps:$4 sm:$0xff]   ;;  %v1302_v27 = vld [vmem:[%s1639_s13 + $0x30] ss:$8 sps:$4 sm:$0xff]   ;;  %v1303_v28 = vld [vmem:[%s1639_s13 + $0x44] ss:$8 sps:$4 sm:$0xff]   ;;  %p1412_p7 = por %p1411_p12, %p1410_p6 }
  0x60   : > { %1095 = vmatpush3.bf16.msra.mxu0 %v1280_v5  ;;  %1173 = vmatpush3.bf16.msra.mxu1 %v1316_v19  ;;  %v1305_v29 = vld [vmem:[%s1639_s13 + $0x40] ss:$8 sps:$4 sm:$0xff]   ;;  %v1306_v30 = vld [vmem:[%s1639_s13 + $0x54] ss:$8 sps:$4 sm:$0xff]   ;;  %v1308_v31 = vld [vmem:[%s1639_s13 + $0x50] ss:$8 sps:$4 sm:$0xff]  }
  0x61   : > { %1096 = vmatprep.subr.bf16.mxu0 %v1281_v6  ;;  %1174 = vmatprep.subr.bf16.mxu1 %v1317_v21  ;;  %v1309_v32 = vld [vmem:[%s1639_s13 + $0x64] ss:$8 sps:$4 sm:$0xff]   ;;  %v1311_v33 = vld [vmem:[%s1639_s13 + $0x60] ss:$8 sps:$4 sm:$0xff]   ;;  %v1312_v34 = vld [vmem:[%s1639_s13 + $0x74] ss:$8 sps:$4 sm:$0xff]   ;;  %p1413_p9 = pnand %p1412_p7, %p1406_p2 }
  0x62   : > { %v1314_v35 = vld [vmem:[%s1639_s13 + $0x70] ss:$8 sps:$4 sm:$0xff]   ;;  %v1321_v38 = vld [vmem:[#allocation7 + $0x8] sm:$0xff]   ;;  %v1322_v39 = vld [vmem:[#allocation7] sm:$0xff]  }
  0x63   : > { %v1319_v36 = vld [vmem:[#allocation7 + $0x18] sm:$0xff]   ;;  %v1320_v37 = vld [vmem:[#allocation7 + $0x10] sm:$0xff]  }
  0x64   : > { %1097 = vmatpush3.bf16.msra.mxu0 %v1282_v7  ;;  %1175 = vmatpush3.bf16.msra.mxu1 %v1317_v21 }
  0x65   : > { %1098 = vmatprep.subr.bf16.mxu0 %v1283_v8  ;;  %1176 = vmatprep.subr.bf16.mxu1 %v1318_v22 }
  0x68   : > { %1099 = vmatpush3.bf16.msra.mxu0 %v1284_v9  ;;  %1177 = vmatpush3.bf16.msra.mxu1 %v1318_v22 }
  0x69   : > { %1100 = vmatprep.subr.bf16.mxu0 %v1285_v10  ;;  %1178 = vmatprep.subr.bf16.mxu1 %v1319_v36 }
  0x6c   : > { %1101 = vmatpush3.bf16.msra.mxu0 %v1286_v12  ;;  %1179 = vmatpush3.bf16.msra.mxu1 %v1319_v36 }
  0x6d   : > { %1102 = vmatprep.subr.bf16.mxu0 %v1287_v13  ;;  %1180 = vmatprep.subr.bf16.mxu1 %v1320_v37 }
  0x70   : > { %1103 = vmatpush3.bf16.msra.mxu0 %v1288_v14  ;;  %1181 = vmatpush3.bf16.msra.mxu1 %v1320_v37 }
  0x71   : > { %1104 = vmatprep.subr.bf16.mxu0 %v1289_v15  ;;  %1182 = vmatprep.subr.bf16.mxu1 %v1321_v38 }
  0x74   : > { %1105 = vmatpush3.bf16.msra.mxu0 %v1290_v16  ;;  %1183 = vmatpush3.bf16.msra.mxu1 %v1321_v38 }
  0x75   : > { %1184 = vmatprep.subr.bf16.mxu1 %v1322_v39 }
  0x77   : > { %506 = vmatmul.mubr.bf16.vlgmr.msra.gmra.mxu0 %v1291_v18 }
  0x78   : > { %513 = vmatprep.mubr.bf16.mxu0 %v1294_v20  ;;  %1185 = vmatpush3.bf16.msra.mxu1 %v1322_v39 }
  0x7f   : > { %514 = vmatmul.mubr.bf16.gmra.mxu0 %v1296_v23 }
  0x80   : > { %521 = vmatprep.mubr.bf16.mxu0 %v1297_v24 }
  0x87   : > { %522 = vmatmul.mubr.bf16.gmra.mxu0 %v1299_v25 }
  0x88   : > { %529 = vmatprep.mubr.bf16.mxu0 %v1300_v26 }
  0x8f   : > { %530 = vmatmul.mubr.bf16.gmra.mxu0 %v1302_v27 }
  0x90   : > { %537 = vmatprep.mubr.bf16.mxu0 %v1303_v28 }
  0x97   : > { %538 = vmatmul.mubr.bf16.gmra.mxu0 %v1305_v29 }
  0x98   : > { %545 = vmatprep.mubr.bf16.mxu0 %v1306_v30 }
  0x9f   : > { %546 = vmatmul.mubr.bf16.gmra.mxu0 %v1308_v31 }
  0xa0   : > { %553 = vmatprep.mubr.bf16.mxu0 %v1309_v32 }
  0xa7   : > { %554 = vmatmul.mubr.bf16.gmra.mxu0 %v1311_v33  ;;  %v994_v33 = vld [vmem:[%s1732_s3] ss:$0 sm:$0xff] }
  0xa8   : > { %561 = vmatprep.mubr.bf16.mxu0 %v1312_v34 }
  0xaf   : > { %562 = vmatmul.mubr.bf16.gmra.mxu0 %v1314_v35 }
 0x137   : > { %v1106_v40 = vpop.f32.mrf.mxu0 }
 0x139   : > { %v1107_v41 = vpop.f32.mrf.mxu0 }
 0x13a   : > { %v1108_v44 = vadd.f32 %v1107_v41, %v1106_v40 }
 0x13b   : > { %v1109_v42 = vpop.f32.mrf.mxu0 }
 0x13d   : > { %v1110_v43 = vpop.f32.mrf.mxu0 }
 0x13e   : > { %v1111_v45 = vadd.f32 %v1110_v43, %v1109_v42 }
 0x13f   : > { %v1112_v46 = vpop.f32.mrf.mxu0 }
 0x140   : > { %v570_v47 = vpack.c.bf16 %v1111_v45, %v1108_v44 }
 0x141   : > { %v1113_v48 = vpop.f32.mrf.mxu0 }
 0x142   : > { %1186 = vmatprep.mubr.bf16.mxu1 %v570_v47  ;;  %v1114_v51 = vadd.f32 %v1113_v48, %v1112_v46 }
 0x143   : > { %v1115_v49 = vpop.f32.mrf.mxu0 }
 0x145   : > { %v1116_v50 = vpop.f32.mrf.mxu0 }
 0x146   : > { %v1117_v52 = vadd.f32 %v1116_v50, %v1115_v49 }
 0x147   : > { %v1118_v53 = vpop.f32.mrf.mxu0 }
 0x148   : > { %v571_v54 = vpack.c.bf16 %v1117_v52, %v1114_v51 }
 0x149   : > { %v1119_v55 = vpop.f32.mrf.mxu0 }
 0x14a   : > { %1187 = vmatmul.mubr.bf16.vlgmr.msra.gmra.mxu1 %v571_v54  ;;  %v1120_v58 = vadd.f32 %v1119_v55, %v1118_v53 }
 0x14b   : > { %v1121_v56 = vpop.f32.mrf.mxu0 }
 0x14d   : > { %v1122_v57 = vpop.f32.mrf.mxu0 }
 0x14e   : > { %v1123_v59 = vadd.f32 %v1122_v57, %v1121_v56 }
 0x14f   : > { %v1124_v60 = vpop.f32.mrf.mxu0 }
 0x150   : > { %v572_v61 = vpack.c.bf16 %v1123_v59, %v1120_v58 }
 0x151   : > { %v1125_v62 = vpop.f32.mrf.mxu0 }
 0x152   : > { %1190 = vmatprep.mubr.bf16.mxu1 %v572_v61  ;;  %v1126_v1 = vadd.f32 %v1125_v62, %v1124_v60 }
 0x153   : > { %v1127_v63 = vpop.f32.mrf.mxu0 }
 0x155   : > { %v1128_v0 = vpop.f32.mrf.mxu0 }
 0x156   : > { %v1129_v2 = vadd.f32 %v1128_v0, %v1127_v63 }
 0x157   : > { %v1130_v3 = vpop.f32.mrf.mxu0 }
 0x158   : > { %v573_v4 = vpack.c.bf16 %v1129_v2, %v1126_v1 }
 0x159   : > { %v1131_v5 = vpop.f32.mrf.mxu0 }
 0x15a   : > { %1191 = vmatmul.mubr.bf16.gmra.mxu1 %v573_v4  ;;  %v1132_v8 = vadd.f32 %v1131_v5, %v1130_v3 }
 0x15b   : > { %v1133_v6 = vpop.f32.mrf.mxu0 }
 0x15d   : > { %v1134_v7 = vpop.f32.mrf.mxu0 }
 0x15e   : > { %v1135_v9 = vadd.f32 %v1134_v7, %v1133_v6 }
 0x15f   : > { %v1136_v10 = vpop.f32.mrf.mxu0 }
 0x160   : > { %v574_v11 = vpack.c.bf16 %v1135_v9, %v1132_v8 }
 0x161   : > { %v1137_v12 = vpop.f32.mrf.mxu0 }
 0x162   : > { %1194 = vmatprep.mubr.bf16.mxu1 %v574_v11  ;;  %v1138_v15 = vadd.f32 %v1137_v12, %v1136_v10 }
 0x163   : > { %v1139_v13 = vpop.f32.mrf.mxu0 }
 0x165   : > { %v1140_v14 = vpop.f32.mrf.mxu0 }
 0x166   : > { %v1141_v16 = vadd.f32 %v1140_v14, %v1139_v13 }
 0x167   : > { %v1142_v17 = vpop.f32.mrf.mxu0 }
 0x168   : > { %v575_v18 = vpack.c.bf16 %v1141_v16, %v1138_v15 }
 0x169   : > { %v1143_v19 = vpop.f32.mrf.mxu0 }
 0x16a   : > { %1195 = vmatmul.mubr.bf16.gmra.mxu1 %v575_v18  ;;  %v1144_v22 = vadd.f32 %v1143_v19, %v1142_v17 }
 0x16b   : > { %v1145_v20 = vpop.f32.mrf.mxu0 }
 0x16d   : > { %v1146_v21 = vpop.f32.mrf.mxu0 }
 0x16e   : > { %v1147_v23 = vadd.f32 %v1146_v21, %v1145_v20 }
 0x16f   : > { %v1148_v24 = vpop.f32.mrf.mxu0 }
 0x170   : > { %v576_v25 = vpack.c.bf16 %v1147_v23, %v1144_v22 }
 0x171   : > { %v1149_v26 = vpop.f32.mrf.mxu0 }
 0x172   : > { %1198 = vmatprep.mubr.bf16.mxu1 %v576_v25  ;;  %v1150_v29 = vadd.f32 %v1149_v26, %v1148_v24 }
 0x173   : > { %v1151_v27 = vpop.f32.mrf.mxu0 }
 0x175   : > { %v1152_v28 = vpop.f32.mrf.mxu0 }
 0x176   : > { %v1153_v30 = vadd.f32 %v1152_v28, %v1151_v27 }
 0x178   : > { %v577_v31 = vpack.c.bf16 %v1153_v30, %v1150_v29 }
 0x17a   : > { %1199 = vmatmul.mubr.bf16.gmra.mxu1 %v577_v31 }
 0x20a   : > { %v1188_v32 = vpop.f32.mrf.mxu1 }
 0x20b   : > { %v692_v35 = vadd.f32 %v1188_v32, %v994_v33 }
 0x20c   : > { %v683_v34 = vpop.f32.mrf.mxu1 }
 0x20d   : > { %v684_v37 = vadd.f32 %v994_v33, %v683_v34  ;;  %v748_v40 = vmax.f32 %v692_v35, 0.0 }
 0x20e   : > { %v1189_v36 = vpop.f32.mrf.mxu1 }
 0x20f   : > { %v695_v38 = vadd.f32 %v1189_v36, %v994_v33  ;;  %v746_v43 = vmax.f32 %v684_v37, 0.0 }
 0x210   : > { %v686_v39 = vpop.f32.mrf.mxu1 }
 0x211   : > { %v749_v41 = vmax.f32 %v695_v38, 0.0  ;;  %v687_v42 = vadd.f32 %v994_v33, %v686_v39 }
 0x213   : > { %v1051_v44 = vpack.c.bf16 %v749_v41, %v748_v40  ;;  %v747_v45 = vmax.f32 %v687_v42, 0.0 }
 0x215   : > { %1083 = vst [vmem:[%s1669_s5 + $0x8] sm:$0xff] %v1051_v44   ;;  %v1046_v46 = vpack.c.bf16 %v747_v45, %v746_v43 }
 0x217   : > { %1047 = vst [vmem:[%s1669_s5] sm:$0xff] %v1046_v46  }
 0x21a   : > { %v1192_v47 = vpop.f32.mrf.mxu1 }
 0x21b   : > { %v708_v49 = vadd.f32 %v1192_v47, %v994_v33 }
 0x21c   : > { %v699_v48 = vpop.f32.mrf.mxu1 }
 0x21d   : > { %v700_v51 = vadd.f32 %v994_v33, %v699_v48  ;;  %v752_v54 = vmax.f32 %v708_v49, 0.0 }
 0x21e   : > { %v1193_v50 = vpop.f32.mrf.mxu1 }
 0x21f   : > { %v711_v52 = vadd.f32 %v1193_v50, %v994_v33  ;;  %v750_v57 = vmax.f32 %v700_v51, 0.0 }
 0x220   : > { %v702_v53 = vpop.f32.mrf.mxu1 }
 0x221   : > { %v753_v55 = vmax.f32 %v711_v52, 0.0  ;;  %v703_v56 = vadd.f32 %v994_v33, %v702_v53 }
 0x223   : > { %v1061_v58 = vpack.c.bf16 %v753_v55, %v752_v54  ;;  %v751_v59 = vmax.f32 %v703_v56, 0.0 }
 0x225   : > { %1085 = vst [vmem:[%s1669_s5 + $0x18] sm:$0xff] %v1061_v58   ;;  %v1056_v60 = vpack.c.bf16 %v751_v59, %v750_v57 }
 0x227   : > { %1084 = vst [vmem:[%s1669_s5 + $0x10] sm:$0xff] %v1056_v60  }
 0x22a   : > { %v1196_v61 = vpop.f32.mrf.mxu1 }
 0x22b   : > { %v724_v63 = vadd.f32 %v1196_v61, %v994_v33 }
 0x22c   : > { %v715_v62 = vpop.f32.mrf.mxu1 }
 0x22d   : > { %v716_v1 = vadd.f32 %v994_v33, %v715_v62  ;;  %v756_v4 = vmax.f32 %v724_v63, 0.0 }
 0x22e   : > { %v1197_v0 = vpop.f32.mrf.mxu1 }
 0x22f   : > { %v727_v2 = vadd.f32 %v1197_v0, %v994_v33  ;;  %v754_v7 = vmax.f32 %v716_v1, 0.0 }
 0x230   : > { %v718_v3 = vpop.f32.mrf.mxu1 }
 0x231   : > { %v757_v5 = vmax.f32 %v727_v2, 0.0  ;;  %v719_v6 = vadd.f32 %v994_v33, %v718_v3 }
 0x233   : > { %v1071_v8 = vpack.c.bf16 %v757_v5, %v756_v4  ;;  %v755_v9 = vmax.f32 %v719_v6, 0.0 }
 0x235   : > { %1087 = vst [vmem:[%s1669_s5 + $0x28] sm:$0xff] %v1071_v8   ;;  %v1066_v10 = vpack.c.bf16 %v755_v9, %v754_v7 }
 0x237   : > { %1086 = vst [vmem:[%s1669_s5 + $0x20] sm:$0xff] %v1066_v10  }
 0x23a   : > { %v1200_v11 = vpop.f32.mrf.mxu1 }
 0x23b   : > { %v740_v13 = vadd.f32 %v1200_v11, %v994_v33 }
 0x23c   : > { %v731_v12 = vpop.f32.mrf.mxu1 }
 0x23d   : > { %v732_v15 = vadd.f32 %v994_v33, %v731_v12  ;;  %v760_v18 = vmax.f32 %v740_v13, 0.0 }
 0x23e   : > { %v1201_v14 = vpop.f32.mrf.mxu1 }
 0x23f   : > { %v743_v16 = vadd.f32 %v1201_v14, %v994_v33  ;;  %v758_v21 = vmax.f32 %v732_v15, 0.0 }
 0x240   : > { %v734_v17 = vpop.f32.mrf.mxu1 }
 0x241   : > { %v761_v19 = vmax.f32 %v743_v16, 0.0  ;;  %v735_v20 = vadd.f32 %v994_v33, %v734_v17 }
 0x243   : > { %v1081_v22 = vpack.c.bf16 %v761_v19, %v760_v18  ;;  %v759_v23 = vmax.f32 %v735_v20, 0.0 }
 0x245   : > { %1089 = vst [vmem:[%s1669_s5 + $0x38] sm:$0xff] %v1081_v22   ;;  %v1076_v24 = vpack.c.bf16 %v759_v23, %v758_v21 }
 0x247   : > { %1088 = vst [vmem:[%s1669_s5 + $0x30] sm:$0xff] %v1076_v24  }
 0x248   : > { %1416 = shalt.err (!%p1413_p9)
}
 0x249   : > { %s1417_s10 = scalar_lea.hbm %s1684_s26, 1024  ;;  %s1421_s21 = scalar_lea.hbm %s1733_s4, 2048 }
 0x24a   : > { %p1418_p13 = scmp.ne.s32.totalorder %s1684_s26, %s1417_s10  ;;  %p1422_p4 = scmp.lt.s32.totalorder %s1684_s26, %s1733_s4 }
 0x24b   : > { %p1423_p8 = scmp.lt.s32.totalorder %s1421_s21, %s1417_s10 }
 0x24c   : > { %p1419_p5 = pnand %p1418_p13, %p1749_p10 }
 0x24d   : > { %p1424_p3 = por %p1423_p8, %p1422_p4 }
 0x24e   : > { %p1420_p0 = pneg %p1419_p5 }
 0x250   : > { %p1425_p11 = pnand %p1424_p3, %p1420_p0 }
 0x252   : > { %1428 = shalt.err (!%p1425_p11)
}
 0x253   : > { %s1481_s5 = smov 64   ;;  %s1482_s7 = smov 4  }
 0x254   : > { %1212 = dma.vmem_to_hbm [thread:$0]  (%p1749_p10), %s1679_s6, 1024, %s1684_s26, %s843_s27, %s1481_s5, %s1481_s5, %s1482_s7  }
 0x255 PF: > { %s871_s25 = sand.u32 1, %s1459_s15   ;;  %p1750_p1 = scmp.ne.s32.totalorder %s1739_s22, 0 }
 0x256   : > { %p1751_p2 = scmp.ge.s32.totalorder %s1471_s18, 2  ;;  %s872_s24 = scalar_lea.sflag [#allocation4], %s871_s25 }
 0x258   : > { %p1226_p6 = pnand %p1751_p2, %p1750_p1 }
 0x25a   : > { %p1227_p12 = pneg %p1226_p6 }
 0x25c   : > { %1454 = dma.done.wait (%p1227_p12), %s872_s24, 1024  }
 0x25d   : > { %1456 = vsyncadd (%p1227_p12), %s872_s24, 4294966272  ;;  %p18_p7 = scmp.ge.s32.totalorder %s1580_s11, 4   ;;  %s1752_s15 = smov %s1463_s16 }
 0x25e   : > { %s1753_s16 = smov %s1467_s17  ;;  %s1754_s17 = smov %s1596_s20 }
 0x25f   : > { %s1755_s18 = smov %s1580_s11  ;;  %20 = sbr.rel (!%p18_p7) target bundleno = 6 (0x6), region = 89 }
 0x264   :  { %877 = vsyncpa [#allocation3], 1 }
 0x265   :  { %879 = vsyncpa [#allocation3 + $0x1], 1 }
 0x266   :  { %880 = vsyncpa [#allocation6], 1 }
 0x267   :  { %881 = vsyncpa [#allocation4], 1 }
 0x268   :  { %883 = vsyncpa [#allocation4 + $0x1], 1 }

</bundles_post_ra>
